<compile_context>
chip_gen: v6e
topology: v6e:2x2x1
jax: 0.10.0
libtpu: 0.0.40
codegen_flags: <defaults>
</compile_context>

<pallas_src>
import math

import jax
import jax.numpy as jnp
from jax.experimental import pallas as pl
from jax.experimental.pallas import tpu as pltpu


def _positional_linear_kernel(x_ref, w_ref, pe_ref, o_ref):
    # x_ref: (TM, K), w_ref: (K, TN), pe_ref: (TM, TN) -> o_ref: (TM, TN)
    z = jnp.dot(x_ref[...], w_ref[...], preferred_element_type=jnp.float32)  # MXU
    o_ref[...] = (z + pe_ref[...]).astype(o_ref.dtype)  # fused f32 add, dense store


def _choose_tm(batch, seq, target):
    """Pick the M (row) tile.

    Returns (tm, pe_reps):
      pe_reps == 0  -> tm divides seq; pe stays (seq, h) and is indexed i % (seq//tm)
      pe_reps >= 1  -> tm == pe_reps * seq; pe is pre-tiled to (tm, h) and resident
    """
    target = max(8, (target // 8) * 8)
    if seq % 8 == 0 and seq >= target:
        for cand in range(target, 7, -8):          # largest 8-aligned divisor of seq
            if seq % cand == 0:
                return cand, 0
        return seq, 1                               # no divisor found: full-seq tile
    if seq % 8 == 0:
        k = max(1, target // seq)                   # stack k full sequences per tile
        while k > 1 and batch % k:
            k -= 1
        return seq * k, k
    # seq not sublane-aligned: single full block (small-shape fallback).
    # TODO(synk): ragged (pl.cdiv) tiling for long, non-8-aligned sequences.
    return batch * seq, batch


def positional_linear_forward(x, weight, bias, pe, *, tm_target=512,
                              compute_dtype=None):
    """x: [B,S,K]; weight: [H,K]; bias: [H]; pe: [max_len,H] -> [B,S,H]."""
    batch, seq, in_dim = x.shape
    h = weight.shape[0]

    if compute_dtype is not None:                   # halve HBM traffic (mem-bound)
        x = x.astype(compute_dtype)
        weight = weight.astype(compute_dtype)

    w_t = weight.T                                  # (K, H): plain (TM,K)x(K,TN) matmul
    # Fold bias into pe once in the wrapper; keep the elementwise add in f32.
    pe_b = pe[:seq].astype(jnp.float32) + bias.astype(jnp.float32)[None, :]

    tn = 256 if h % 256 == 0 else (128 if h % 128 == 0 else h)
    tm, pe_reps = _choose_tm(batch, seq, tm_target)

    m = batch * seq
    x2 = x.reshape(m, in_dim)

    if pe_reps >= 1:
        pe_in = jnp.tile(pe_b, (pe_reps, 1)) if pe_reps > 1 else pe_b   # (tm, h)
    else:
        pe_in = pe_b                                                    # (seq, h)
    pe_blocks = pe_in.shape[0] // tm

    if pe_blocks == 1:
        pe_spec = pl.BlockSpec((tm, tn), lambda j, i: (0, j))           # resident
    else:
        pe_spec = pl.BlockSpec((tm, tn), lambda j, i: (i % pe_blocks, j))

    # VMEM budget from the actual double-buffered blocks (+ headroom).
    x_bytes = jnp.dtype(x2.dtype).itemsize
    block_bytes = 2 * (tm * in_dim * x_bytes        # x (double-buffered)
                       + in_dim * tn * x_bytes      # weight slab
                       + tm * tn * 4                # pe (f32)
                       + tm * tn * x_bytes)         # out
    vmem_limit = int(min(max(2 * block_bytes + (8 << 20), 32 << 20), 96 << 20))

    out = pl.pallas_call(
        _positional_linear_kernel,
        out_shape=jax.ShapeDtypeStruct((m, h), x2.dtype),
        grid_spec=pltpu.PrefetchScalarGridSpec(
            num_scalar_prefetch=0,
            grid=(h // tn, m // tm),                # h-tiles outermost => weight reuse
            in_specs=[
                pl.BlockSpec((tm, in_dim), lambda j, i: (i, 0)),
                pl.BlockSpec((in_dim, tn), lambda j, i: (0, j)),   # resident per j
                pe_spec,
            ],
            out_specs=pl.BlockSpec((tm, tn), lambda j, i: (i, j)),
        ),
        compiler_params=pltpu.CompilerParams(
            dimension_semantics=("parallel", "parallel"),
            vmem_limit_bytes=vmem_limit,
        ),
    )(x2, w_t, pe_in)
    return out.reshape(batch, seq, h)


def make_positional_encoding(max_len, h):
    """Sinusoidal PE, identical to the PyTorch buffer construction."""
    pos = jnp.arange(max_len, dtype=jnp.float32)[:, None]
    div = jnp.exp(jnp.arange(0, h, 2, dtype=jnp.float32) * (-math.log(10000.0) / h))
    ang = pos * div                                  # [max_len, h//2]
    out = jnp.zeros((max_len, h), dtype=jnp.float32)
    out = out.at[:, 0::2].set(jnp.sin(ang))
    out = out.at[:, 1::2].set(jnp.cos(ang))
    return out


if __name__ == "__main__":
    key = jax.random.PRNGKey(0)
    kx, kw, kb = jax.random.split(key, 3)

    # Small shapes consistent with the module; seq multiple of 8, h multiple of 128.
    batch, seq, in_dim, h, max_len = 2, 16, 16, 128, 64

    x = jax.random.normal(kx, (batch, seq, in_dim), dtype=jnp.float32)
    bound = 1.0 / math.sqrt(in_dim)
    w = jax.random.uniform(kw, (h, in_dim), minval=-bound, maxval=bound,
                           dtype=jnp.float32)           # nn.Linear weight [h, in_dim]
    b = jax.random.uniform(kb, (h,), minval=-bound, maxval=bound,
                           dtype=jnp.float32)           # nn.Linear bias [h]
    pe = make_positional_encoding(max_len, h)           # [max_len, h]

    # Reference: PyTorch forward -> z = x @ W.T + b ; y = z + pe[:, :seq]
    ref = jnp.einsum("bsk,hk->bsh", x, w) + b[None, None, :] + pe[None, :seq, :]

    # f32 path: exact module semantics.
    out = jax.block_until_ready(positional_linear_forward(x, w, b, pe))
    assert out.shape == (batch, seq, h)
    assert jnp.allclose(out, ref, atol=1e-5, rtol=1e-5), "f32 mismatch vs reference"

    # bf16-traffic path: bf16 loads/stores, f32 MXU accumulate + f32 pe add.
    out_bf16 = jax.block_until_ready(
        positional_linear_forward(x, w, b, pe, compute_dtype=jnp.bfloat16))
    assert out_bf16.dtype == jnp.bfloat16
    assert jnp.allclose(out_bf16.astype(jnp.float32), ref, atol=5e-2, rtol=5e-2), \
        "bf16 mismatch vs reference"

    print("KERNEL_OK")
</pallas_src>

<mosaic_0001>
module attributes {stable_mosaic.version = 11 : i64} {
  func.func @_positional_linear_kernel(%arg0: i32, %arg1: i32, %arg2: memref<32x16xf32, #tpu.memory_space<vmem>>, %arg3: memref<16x128xf32, #tpu.memory_space<vmem>>, %arg4: memref<32x128xf32, #tpu.memory_space<vmem>>, %arg5: memref<32x128xf32, #tpu.memory_space<vmem>>) attributes {dimension_semantics = [#tpu.dimension_semantics<parallel>, #tpu.dimension_semantics<parallel>], iteration_bounds = array<i64: 1, 1>, scalar_prefetch = 0 : i64, scratch_operands = 0 : i64, tpu.core_type = #tpu.core_type<tc>, window_params = [{transform_indices = @transform_0, window_bounds = array<i64: 32, 16>}, {transform_indices = @transform_1, window_bounds = array<i64: 16, 128>}, {transform_indices = @transform_2, window_bounds = array<i64: 32, 128>}, {transform_indices = @transform_3, window_bounds = array<i64: 32, 128>}]} {
    %c0 = arith.constant 0 : index
    %c0_0 = arith.constant 0 : index
    %0 = vector.load %arg2[%c0, %c0_0] : memref<32x16xf32, #tpu.memory_space<vmem>>, vector<32x16xf32>
    %c0_1 = arith.constant 0 : index
    %c0_2 = arith.constant 0 : index
    %1 = vector.load %arg3[%c0_1, %c0_2] : memref<16x128xf32, #tpu.memory_space<vmem>>, vector<16x128xf32>
    %cst = arith.constant dense<0.000000e+00> : vector<32x128xf32>
    %2 = tpu.matmul %0, %1, %cst {dimension_numbers = #tpu.dot_dimension_numbers<[1], [0], [0], [1], [0, 0, 1, 1], [], []>} : vector<32x16xf32>, vector<16x128xf32>, vector<32x128xf32> -> vector<32x128xf32>
    %c0_3 = arith.constant 0 : index
    %c0_4 = arith.constant 0 : index
    %3 = vector.load %arg4[%c0_3, %c0_4] : memref<32x128xf32, #tpu.memory_space<vmem>>, vector<32x128xf32>
    %4 = arith.addf %2, %3 : vector<32x128xf32>
    %c0_5 = arith.constant 0 : index
    %c0_6 = arith.constant 0 : index
    %5 = vector.load %arg5[%c0_5, %c0_6] : memref<32x128xf32, #tpu.memory_space<vmem>>, vector<32x128xf32>
    tpu.vector_store %arg5[%c0_5, %c0_6], %4 {strides = array<i32>} : memref<32x128xf32, #tpu.memory_space<vmem>>, vector<32x128xf32>,
    return
  }
  func.func @transform_0(%arg0: i32, %arg1: i32) -> (i32, i32) {
    %c0_i32 = arith.constant 0 : i32
    %c0_i32_0 = arith.constant 0 : i32
    return %arg1, %c0_i32 : i32, i32
  }
  func.func @transform_1(%arg0: i32, %arg1: i32) -> (i32, i32) {
    %c0_i32 = arith.constant 0 : i32
    %c0_i32_0 = arith.constant 0 : i32
    return %c0_i32, %arg0 : i32, i32
  }
  func.func @transform_2(%arg0: i32, %arg1: i32) -> (i32, i32) {
    %c0_i32 = arith.constant 0 : i32
    %c0_i32_0 = arith.constant 0 : i32
    return %c0_i32, %arg0 : i32, i32
  }
  func.func @transform_3(%arg0: i32, %arg1: i32) -> (i32, i32) {
    %c0_i32 = arith.constant 0 : i32
    return %arg1, %arg0 : i32, i32
  }
}

</mosaic_0001>

<bundles_post_ra>
// kernel: tpu_custom_call.1
= control target key start
LH: loop header
LB: loop body
LE: loop exit
PB: predicated region body
PF: predicated region fallthrough
CT: control target
= control target key end

     0   :  { %vm25_vm0 = vcmask 130048   ;;  %s248_s0 = inlined_call_operand.vmem [shape: f32[32,16], index: 0, kind: input, shape index: {}]   ;;  %s249_s1 = inlined_call_operand.vmem [shape: f32[16,128], index: 1, kind: input, shape index: {}]   ;;  %s250_s2 = inlined_call_operand.vmem [shape: f32[32,128], index: 2, kind: input, shape index: {}]   ;;  %s251_s3 = inlined_call_operand.hbm [shape: f32[32,128], index: 3, kind: output, shape index: {}]  }
   0x1   :  { %v20_v0 = vld [vmem:[%s249_s1 + $0x8] sm:$0xff]  ;;  %v19_v1 = vld [vmem:[%s249_s1] sm:$0xff]  ;;  %v17_v3 = vld [vmem:[%s248_s0 + $0x10] sm:$0xff] }
   0x2   :  { %153 = vmatprep.subr.mxu0 %v20_v0  ;;  %163 = vmatprep.subr.mxu1 %v20_v0  ;;  %v15_v2 = vld [vmem:[%s248_s0] sm:$0xff] }
   0x3   :  { %154 = vmatpush3.msra.mxu0 %v20_v0  ;;  %165 = vmatpush3.msra.mxu1 %v20_v0 }
   0x4   :  { %8 = vsyncpa [#allocation3], 0  ;;  %155 = vmatprep.subr.mxu0 %v19_v1  ;;  %164 = vmatprep.subr.mxu1 %v19_v1  ;;  %v16_v4 = vld [vmem:[%s248_s0 + $0x8] sm:$0xff]  ;;  %v18_v5 = vld [vmem:[%s248_s0 + $0x18] sm:$0xff]  ;;  %s192_s27 = smov [#allocation2]  }
   0x5   :  { %156 = vmatpush3.msra.mxu0 %v19_v1  ;;  %166 = vmatpush3.msra.mxu1 %v19_v1  ;;  %v22_v6 = vld [vmem:[%s250_s2 + $0x8] sm:$0xff]  ;;  %v24_v7 = vld [vmem:[%s250_s2 + $0x18] sm:$0xff]  ;;  %s132_s28 = sshll.u32 %s192_s27, 4  ;;  %v21_v10 = vld [vmem:[%s250_s2] sm:$0xff]  ;;  %s133_s28 = int_to_ptr.vmem [resolvable:$true] %s132_s28 }
   0x6   :  { %157 = vmatprep.mubr.msk.f32.mxu0 %vm25_vm0, %v15_v2  ;;  %160 = vmatprep.mubr.msk.f32.mxu1 %vm25_vm0, %v17_v3  ;;  %v23_v11 = vld [vmem:[%s250_s2 + $0x10] sm:$0xff]  ;;  %s170_s5 = scalar_lea.vmem %s133_s28, 512  ;;  %p175_p1 = scmp.lt.s32.totalorder %s133_s28, %s133_s28 }
   0x7   :  { %158 = vmatmul.mubr.msk.f32.vlgmr.msra.gmra.mxu0 %vm25_vm0, %v16_v4  ;;  %161 = vmatmul.mubr.msk.f32.vlgmr.msra.gmra.mxu1 %vm25_vm0, %v18_v5  ;;  %p171_p0 = scmp.ne.s32.totalorder %s133_s28, %s170_s5  ;;  %p176_p2 = scmp.lt.s32.totalorder %s170_s5, %s170_s5 }
   0x9   :  { %p177_p3 = por %p176_p2, %p175_p1 }
   0xb   :  { %p178_p4 = pnand %p177_p3, %p171_p0 }
  0xc7   :  { %v159_v8 = vpop.f32.mrf.mxu0  ;;  %v162_v9 = vpop.f32.mrf.mxu1 }
  0xc8   :  { %v110_v12 = vadd.f32 %v159_v8, %v22_v6  ;;  %v120_v13 = vadd.f32 %v162_v9, %v24_v7 }
  0xc9   :  { %v104_v14 = vpop.f32.mrf.mxu0  ;;  %v114_v15 = vpop.f32.mrf.mxu1 }
  0xca   :  { %124 = vst [vmem:[#allocation2 + $0x8] sm:$0xff] %v110_v12  ;;  %126 = vst [vmem:[#allocation2 + $0x18] sm:$0xff] %v120_v13  ;;  %v105_v16 = vadd.f32 %v104_v14, %v21_v10  ;;  %v115_v17 = vadd.f32 %v114_v15, %v23_v11 }
  0xcc   :  { %123 = vst [vmem:[#allocation2] sm:$0xff] %v105_v16  ;;  %125 = vst [vmem:[#allocation2 + $0x10] sm:$0xff] %v115_v17 }
  0xcd   :  { %181 = shalt.err (!%p178_p4)
}
  0xce   :  { %s193_s6 = smov 128   ;;  %s194_s2 = smov 8  }
  0xcf   :  { %138 = dma.vmem_to_hbm [thread:$0]  %s133_s28, 512, %s251_s3, [#allocation3], %s193_s6, %s193_s6, %s194_s2  }
  0xd0   :  { %190 = dma.done.wait [#allocation3], 512  }
  0xd1   :  { %191 = vsyncadd [#allocation3], 4294966784 }
  0xd2   :  { %142 = vsyncpa [#allocation3], 1 }

</bundles_post_ra>
